<compile_context>
chip_gen: v7x
topology: tpu7x:2x2x1
jax: 0.10.0
libtpu: 0.0.40
codegen_flags: <defaults>
</compile_context>

<pallas_src>
import functools

import jax
import jax.numpy as jnp
from jax.experimental import pallas as pl
from jax.experimental.pallas import tpu as pltpu

_NEG_BIG = -1e30  # f32 bias pad: exp(-1e30 - m) == 0 and relu(-1e30) == 0


def _round_up(n: int, m: int) -> int:
    return ((n + m - 1) // m) * m


def _itemsize(dt) -> int:
    dt = jnp.result_type(dt)
    if jnp.issubdtype(dt, jnp.floating):
        return jnp.finfo(dt).bits // 8
    return jnp.iinfo(dt).bits // 8


# Probe: pipeline_mode=pl.Buffered(1) on constant-index (resident) blocks
# saves one VMEM buffer per weight; degrade cleanly if unsupported.
try:
    pl.BlockSpec((8, 128), lambda i: (0, 0), pipeline_mode=pl.Buffered(1))
    _HAS_SINGLE_BUFFER = True
except Exception:  # pragma: no cover
    _HAS_SINGLE_BUFFER = False


def _resident_spec(block_shape):
    if _HAS_SINGLE_BUFFER:
        return pl.BlockSpec(block_shape, lambda i: (0, 0),
                            pipeline_mode=pl.Buffered(1))
    return pl.BlockSpec(block_shape, lambda i: (0, 0))


def _vmem_capacity_bytes() -> int:
    try:
        cap = int(pltpu.get_tpu_info().vmem_capacity_bytes)
        if cap > 0:
            return cap
    except Exception:
        pass
    return 64 * 1024 * 1024  # v7x physical VMEM: safe floor for every gen


def _make_dpp_kernel(with_alpha: bool, mxu_dtype):
    """Fused: out = relu(x @ w1 + b1) @ w2 + b2 (+ alphas = softmax(x@w1+b1))."""

    def kernel(x_ref, w1_ref, b1_ref, w2_ref, b2_ref, out_ref, *alpha_refs):
        # dpp_layer1 pre-activation: operands already in mxu_dtype (cast in
        # HBM by the wrapper), f32 MXU accumulation, f32 bias add.
        h_pre = jnp.dot(x_ref[...], w1_ref[...],
                        preferred_element_type=jnp.float32) + b1_ref[...]

        if with_alpha:
            # Softmax over the (padded) hidden axis, f32, exact normalizer.
            alpha_ref = alpha_refs[0]
            m = jnp.max(h_pre, axis=-1, keepdims=True)
            e = jnp.exp(h_pre - m)
            alpha = e / jnp.sum(e, axis=-1, keepdims=True)
            alpha_ref[...] = alpha.astype(alpha_ref.dtype)

        # relu1 (f32), then fc_out on the MXU.
        h = jnp.maximum(h_pre, 0.0).astype(mxu_dtype)
        out = jnp.dot(h, w2_ref[...],
                      preferred_element_type=jnp.float32) + b2_ref[...]
        out_ref[...] = out.astype(out_ref.dtype)

    return kernel


@functools.partial(jax.jit,
                   static_argnames=("return_alpha_flag", "mxu_dtype",
                                    "max_block_b"))
def dpp_model_forward(x, w1, b1, w2, b2, *, return_alpha_flag=False,
                      mxu_dtype=jnp.bfloat16, max_block_b=2048):
    """Fused DPPModelBase forward.

    Shapes: x [B, In], w1 [In, H], b1 [1, H], w2 [H, O], b2 [1, O]
    (weights stored transposed relative to PyTorch: x @ w + b == x @ W.T + b).
    Returns out [B, O] (and alphas [B, H] when return_alpha_flag=True).
    """
    B, IN = x.shape
    H = w1.shape[1]
    O = w2.shape[1]

    out_dtype = x.dtype      # model output matches input dtype
    alpha_dtype = x.dtype    # halves alpha writeback when inputs are bf16
    mxu_sz = _itemsize(mxu_dtype)
    out_sz = _itemsize(out_dtype)
    alpha_sz = _itemsize(alpha_dtype)

    # Lane-dense stores: pad hidden / output feature dims to multiples of 128.
    H_pad = _round_up(H, 128)
    O_pad = _round_up(O, 128)

    # Generation-aware VMEM budget for tile sizing.
    vmem_cap = _vmem_capacity_bytes()
    budget = int(vmem_cap * 0.55)
    resident_bufs = 1 if _HAS_SINGLE_BUFFER else 2
    resident_bytes = resident_bufs * ((IN * H_pad + H_pad * O_pad) * mxu_sz
                                      + (H_pad + O_pad) * 4)
    # TODO(synk): if resident weights alone ever exceed the budget (very large
    # hidden_size_dpp on v7x's 64 MiB VMEM), fall back to a hidden/output-tiled
    # grid with a VMEM f32 accumulator + pl.when init/finalize.

    def _tile_bytes(tb):
        stream = tb * IN * mxu_sz + tb * O_pad * out_sz          # double-buffered
        if return_alpha_flag:
            stream += tb * H_pad * alpha_sz
        interm = tb * H_pad * 4 * 2 + tb * O_pad * 4             # f32 temporaries
        return 2 * stream + resident_bytes + interm

    # Batch tile: grow to whatever fits the budget (multiple of 8 sublanes).
    B8 = _round_up(B, 8)
    TB = min(B8, _round_up(max_block_b, 8))
    while TB > 8 and _tile_bytes(TB) > budget:
        TB = max(8, (TB // 2 // 8) * 8)
    # v7x megacore: make sure both TensorCores get work when the batch allows.
    if B8 // TB <= 1 and B8 >= 16:
        TB = max(8, _round_up((B8 + 1) // 2, 8))

    B_pad = _round_up(B, TB)

    # Pad operands.  Padded hidden units get a huge negative *f32* bias so
    # they are exactly zero after both softmax and ReLU; padded rows of w2
    # are zero.  Streamed x and resident weights are pre-cast to mxu_dtype
    # in HBM (halves the dominant DMA traffic).
    xp = jnp.pad(x, ((0, B_pad - B), (0, 0))).astype(mxu_dtype)
    w1p = jnp.pad(w1, ((0, 0), (0, H_pad - H))).astype(mxu_dtype)
    b1p = jnp.pad(b1, ((0, 0), (0, H_pad - H)),
                  constant_values=_NEG_BIG).astype(jnp.float32)
    w2p = jnp.pad(w2, ((0, H_pad - H), (0, O_pad - O))).astype(mxu_dtype)
    b2p = jnp.pad(b2, ((0, 0), (0, O_pad - O))).astype(jnp.float32)

    in_specs = [
        pl.BlockSpec((TB, IN), lambda i: (i, 0)),   # x streams over the batch
        _resident_spec((IN, H_pad)),                # weights/biases stay put
        _resident_spec((1, H_pad)),
        _resident_spec((H_pad, O_pad)),
        _resident_spec((1, O_pad)),
    ]
    out_spec_main = pl.BlockSpec((TB, O_pad), lambda i: (i, 0))

    if return_alpha_flag:
        out_shape = (jax.ShapeDtypeStruct((B_pad, O_pad), out_dtype),
                     jax.ShapeDtypeStruct((B_pad, H_pad), alpha_dtype))
        out_specs = (out_spec_main,
                     pl.BlockSpec((TB, H_pad), lambda i: (i, 0)))
    else:
        out_shape = jax.ShapeDtypeStruct((B_pad, O_pad), out_dtype)
        out_specs = out_spec_main

    flops = 2 * B_pad * (IN * H_pad + H_pad * O_pad)
    transcendentals = B_pad * H_pad if return_alpha_flag else 0
    bytes_accessed = (B_pad * IN * mxu_sz                        # x
                      + (IN * H_pad + H_pad * O_pad) * mxu_sz    # w1, w2
                      + (H_pad + O_pad) * 4                      # b1, b2
                      + B_pad * O_pad * out_sz                   # out
                      + (B_pad * H_pad * alpha_sz if return_alpha_flag else 0))

    vmem_limit = int(min(vmem_cap * 0.9,
                         max(_tile_bytes(TB) + 8 * 1024 * 1024,
                             32 * 1024 * 1024)))

    result = pl.pallas_call(
        _make_dpp_kernel(return_alpha_flag, mxu_dtype),
        out_shape=out_shape,
        grid=(B_pad // TB,),
        in_specs=in_specs,
        out_specs=out_specs,
        compiler_params=pltpu.CompilerParams(
            dimension_semantics=("parallel",),
            vmem_limit_bytes=vmem_limit),
        cost_estimate=pl.CostEstimate(
            flops=flops,
            transcendentals=transcendentals,
            bytes_accessed=bytes_accessed),
    )(xp, w1p, b1p, w2p, b2p)

    if return_alpha_flag:
        out_p, alpha_p = result
        return out_p[:B, :O], alpha_p[:B, :H]
    return result[:B, :O]


if __name__ == "__main__":
    # Shapes consistent with the module: batch=8, input_size=16,
    # hidden_size_dpp=32, output_size=8.
    B, IN, H, O = 8, 16, 32, 8

    key = jax.random.PRNGKey(0)
    kx, k1, kb1, k2, kb2 = jax.random.split(key, 5)

    x = jax.random.normal(kx, (B, IN), dtype=jnp.float32)
    w1 = jax.random.normal(k1, (IN, H), dtype=jnp.float32) * 0.1
    b1 = jax.random.normal(kb1, (1, H), dtype=jnp.float32) * 0.01
    w2 = jax.random.normal(k2, (H, O), dtype=jnp.float32) * 0.1
    b2 = jax.random.normal(kb2, (1, O), dtype=jnp.float32) * 0.01

    # Pure-JAX references.
    h_pre_ref = x @ w1 + b1
    out_ref = jnp.maximum(h_pre_ref, 0.0) @ w2 + b2
    alpha_ref = jax.nn.softmax(h_pre_ref, axis=-1)

    # Exact path (f32 MXU operands), with alphas.
    out_f32, alphas = dpp_model_forward(x, w1, b1, w2, b2,
                                        return_alpha_flag=True,
                                        mxu_dtype=jnp.float32)
    jax.block_until_ready((out_f32, alphas))
    assert out_f32.shape == (B, O) and alphas.shape == (B, H)
    assert jnp.allclose(out_f32, out_ref, atol=1e-5, rtol=1e-5), "out mismatch (f32)"
    assert jnp.allclose(alphas, alpha_ref, atol=1e-3, rtol=1e-3), "alpha mismatch (f32)"
    assert jnp.allclose(jnp.sum(alphas, axis=-1), 1.0, atol=1e-3), "alphas not normalized"

    # Fast path: bf16 HBM streams / MXU operands (f32 accumulation), no alphas.
    out_bf16 = dpp_model_forward(x, w1, b1, w2, b2,
                                 return_alpha_flag=False,
                                 mxu_dtype=jnp.bfloat16)
    jax.block_until_ready(out_bf16)
    assert out_bf16.shape == (B, O)
    assert jnp.allclose(out_bf16, out_ref, atol=3e-2, rtol=3e-2), "out mismatch (bf16)"

    # bf16 path with alphas (softmax computed from bf16-precision pre-activations).
    out_bf16a, alphas_bf16 = dpp_model_forward(x, w1, b1, w2, b2,
                                               return_alpha_flag=True,
                                               mxu_dtype=jnp.bfloat16)
    jax.block_until_ready((out_bf16a, alphas_bf16))
    assert jnp.allclose(alphas_bf16, alpha_ref, atol=3e-2, rtol=3e-2), "alpha mismatch (bf16)"

    print("KERNEL_OK")
</pallas_src>

<mosaic_0001>
module attributes {stable_mosaic.version = 11 : i64} {
  func.func @kernel(%arg0: i32, %arg1: memref<8x16xf32, #tpu.memory_space<vmem>>, %arg2: memref<16x128xf32, #tpu.memory_space<vmem>>, %arg3: memref<1x128xf32, #tpu.memory_space<vmem>>, %arg4: memref<128x128xf32, #tpu.memory_space<vmem>>, %arg5: memref<1x128xf32, #tpu.memory_space<vmem>>, %arg6: memref<8x128xf32, #tpu.memory_space<vmem>>, %arg7: memref<8x128xf32, #tpu.memory_space<vmem>>) attributes {dimension_semantics = [#tpu.dimension_semantics<parallel>], iteration_bounds = array<i64: 1>, scalar_prefetch = 0 : i64, scratch_operands = 0 : i64, tpu.core_type = #tpu.core_type<tc>, window_params = [{transform_indices = @transform_0, window_bounds = array<i64: 8, 16>}, {pipeline_mode = #tpu.pipeline_mode<synchronous>, transform_indices = @transform_1, window_bounds = array<i64: 16, 128>}, {pipeline_mode = #tpu.pipeline_mode<synchronous>, transform_indices = @transform_2, window_bounds = array<i64: 1, 128>}, {pipeline_mode = #tpu.pipeline_mode<synchronous>, transform_indices = @transform_3, window_bounds = array<i64: 128, 128>}, {pipeline_mode = #tpu.pipeline_mode<synchronous>, transform_indices = @transform_4, window_bounds = array<i64: 1, 128>}, {transform_indices = @transform_5, window_bounds = array<i64: 8, 128>}, {transform_indices = @transform_6, window_bounds = array<i64: 8, 128>}]} {
    %c0 = arith.constant 0 : index
    %c0_0 = arith.constant 0 : index
    %0 = vector.load %arg1[%c0, %c0_0] : memref<8x16xf32, #tpu.memory_space<vmem>>, vector<8x16xf32>
    %c0_1 = arith.constant 0 : index
    %c0_2 = arith.constant 0 : index
    %1 = vector.load %arg2[%c0_1, %c0_2] : memref<16x128xf32, #tpu.memory_space<vmem>>, vector<16x128xf32>
    %cst = arith.constant dense<0.000000e+00> : vector<8x128xf32>
    %2 = tpu.matmul %0, %1, %cst {dimension_numbers = #tpu.dot_dimension_numbers<[1], [0], [0], [1], [0, 0, 1, 1], [], []>} : vector<8x16xf32>, vector<16x128xf32>, vector<8x128xf32> -> vector<8x128xf32>
    %c0_3 = arith.constant 0 : index
    %c0_4 = arith.constant 0 : index
    %3 = vector.load %arg3[%c0_3, %c0_4] : memref<1x128xf32, #tpu.memory_space<vmem>>, vector<1x128xf32>
    %4 = vector.broadcast %3 : vector<1x128xf32> to vector<8x128xf32>
    %5 = arith.addf %2, %4 : vector<8x128xf32>
    %cst_5 = arith.constant dense<0xFF800000> : vector<8xf32>
    %6 = vector.multi_reduction <maximumf>, %5, %cst_5 [1] : vector<8x128xf32> to vector<8xf32>
    %7 = vector.shape_cast %6 : vector<8xf32> to vector<8x1xf32>
    %8 = vector.broadcast %7 : vector<8x1xf32> to vector<8x128xf32>
    %9 = arith.subf %5, %8 : vector<8x128xf32>
    %10 = math.exp %9 : vector<8x128xf32>
    %cst_6 = arith.constant dense<0.000000e+00> : vector<8xf32>
    %11 = vector.multi_reduction <add>, %10, %cst_6 [1] : vector<8x128xf32> to vector<8xf32>
    %12 = vector.shape_cast %11 : vector<8xf32> to vector<8x1xf32>
    %13 = vector.broadcast %12 : vector<8x1xf32> to vector<8x128xf32>
    %14 = arith.divf %10, %13 : vector<8x128xf32>
    %c0_7 = arith.constant 0 : index
    %c0_8 = arith.constant 0 : index
    %15 = vector.load %arg7[%c0_7, %c0_8] : memref<8x128xf32, #tpu.memory_space<vmem>>, vector<8x128xf32>
    tpu.vector_store %arg7[%c0_7, %c0_8], %14 {strides = array<i32>} : memref<8x128xf32, #tpu.memory_space<vmem>>, vector<8x128xf32>,
    %cst_9 = arith.constant 0.000000e+00 : f32
    %16 = vector.broadcast %cst_9 : f32 to vector<8x128xf32>
    %17 = arith.maximumf %5, %16 : vector<8x128xf32>
    %c0_10 = arith.constant 0 : index
    %c0_11 = arith.constant 0 : index
    %18 = vector.load %arg4[%c0_10, %c0_11] : memref<128x128xf32, #tpu.memory_space<vmem>>, vector<128x128xf32>
    %cst_12 = arith.constant dense<0.000000e+00> : vector<8x128xf32>
    %19 = tpu.matmul %17, %18, %cst_12 {dimension_numbers = #tpu.dot_dimension_numbers<[1], [0], [0], [1], [0, 0, 1, 1], [], []>} : vector<8x128xf32>, vector<128x128xf32>, vector<8x128xf32> -> vector<8x128xf32>
    %c0_13 = arith.constant 0 : index
    %c0_14 = arith.constant 0 : index
    %20 = vector.load %arg5[%c0_13, %c0_14] : memref<1x128xf32, #tpu.memory_space<vmem>>, vector<1x128xf32>
    %21 = vector.broadcast %20 : vector<1x128xf32> to vector<8x128xf32>
    %22 = arith.addf %19, %21 : vector<8x128xf32>
    %c0_15 = arith.constant 0 : index
    %c0_16 = arith.constant 0 : index
    %23 = vector.load %arg6[%c0_15, %c0_16] : memref<8x128xf32, #tpu.memory_space<vmem>>, vector<8x128xf32>
    tpu.vector_store %arg6[%c0_15, %c0_16], %22 {strides = array<i32>} : memref<8x128xf32, #tpu.memory_space<vmem>>, vector<8x128xf32>,
    return
  }
  func.func @transform_0(%arg0: i32) -> (i32, i32) {
    %c0_i32 = arith.constant 0 : i32
    %c0_i32_0 = arith.constant 0 : i32
    return %arg0, %c0_i32 : i32, i32
  }
  func.func @transform_1(%arg0: i32) -> (i32, i32) {
    %c0_i32 = arith.constant 0 : i32
    %c0_i32_0 = arith.constant 0 : i32
    %c0_i32_1 = arith.constant 0 : i32
    return %c0_i32, %c0_i32_0 : i32, i32
  }
  func.func @transform_2(%arg0: i32) -> (i32, i32) {
    %c0_i32 = arith.constant 0 : i32
    %c0_i32_0 = arith.constant 0 : i32
    %c0_i32_1 = arith.constant 0 : i32
    return %c0_i32, %c0_i32_0 : i32, i32
  }
  func.func @transform_3(%arg0: i32) -> (i32, i32) {
    %c0_i32 = arith.constant 0 : i32
    %c0_i32_0 = arith.constant 0 : i32
    %c0_i32_1 = arith.constant 0 : i32
    return %c0_i32, %c0_i32_0 : i32, i32
  }
  func.func @transform_4(%arg0: i32) -> (i32, i32) {
    %c0_i32 = arith.constant 0 : i32
    %c0_i32_0 = arith.constant 0 : i32
    %c0_i32_1 = arith.constant 0 : i32
    return %c0_i32, %c0_i32_0 : i32, i32
  }
  func.func @transform_5(%arg0: i32) -> (i32, i32) {
    %c0_i32 = arith.constant 0 : i32
    %c0_i32_0 = arith.constant 0 : i32
    return %arg0, %c0_i32 : i32, i32
  }
  func.func @transform_6(%arg0: i32) -> (i32, i32) {
    %c0_i32 = arith.constant 0 : i32
    %c0_i32_0 = arith.constant 0 : i32
    return %arg0, %c0_i32 : i32, i32
  }
}

</mosaic_0001>

<bundles_post_ra>
// kernel: dpp_model_forward.1
= control target key start
LH: loop header
LB: loop body
LE: loop exit
PB: predicated region body
PF: predicated region fallthrough
CT: control target
= control target key end

     0   :  { %12 = vsyncpa [#allocation3], 0  ;;  %v390_v2 = vmov 0.0|0.0   ;;  %vm391_vm0 = vmmov 0   ;;  %v392_v4 = vmov 0.0   ;;  %vm34_vm1 = vcmask 130048   ;;  %s517_s0 = inlined_call_operand.vmem [shape: f32[8,16], index: 0, kind: input, shape index: {}]   ;;  %s518_s1 = inlined_call_operand.vmem [shape: f32[16,128], index: 1, kind: input, shape index: {}]   ;;  %s519_s2 = inlined_call_operand.vmem [shape: f32[1,128], index: 2, kind: input, shape index: {}]   ;;  %s520_s3 = inlined_call_operand.vmem [shape: f32[128,128], index: 3, kind: input, shape index: {}]   ;;  %s521_s4 = inlined_call_operand.vmem [shape: f32[1,128], index: 4, kind: input, shape index: {}]   ;;  %s522_s5 = inlined_call_operand.hbm [shape: f32[8,128], index: 5, kind: output, shape index: {0}]   ;;  %s523_s6 = inlined_call_operand.hbm [shape: f32[8,128], index: 6, kind: output, shape index: {1}]  }
   0x1   :  { %v25_v0 = vld [vmem:[%s518_s1] sm:$0xff]  ;;  %v26_v1 = vld [vmem:[%s518_s1 + $0x8] sm:$0xff]  ;;  %306 = vmatprep.subr.bf16.mxu0 %v390_v2  ;;  %268 = vmatprep.mubr.msk.f32.mxu0 %vm391_vm0, %v392_v4  ;;  %v121_v7 = vld [vmem:[%s520_s3 + $0x10] sm:$0xff] }
   0x2   :  { %v307_v3 = vpack.c.bf16 %v26_v1, %v25_v0  ;;  %v119_v5 = vld [vmem:[%s520_s3] sm:$0xff]  ;;  %v120_v6 = vld [vmem:[%s520_s3 + $0x8] sm:$0xff]  ;;  %309 = vmatprep.subr.bf16.mxu1 %v390_v2  ;;  %v122_v9 = vld [vmem:[%s520_s3 + $0x18] sm:$0xff]  ;;  %303 = vmatprep.mubr.msk.f32.mxu1 %vm391_vm0, %v392_v4 }
   0x3   :  { %v310_v8 = vpack.c.bf16 %v120_v6, %v119_v5  ;;  %v24_v10 = vld [vmem:[%s517_s0] sm:$0xff]  ;;  %v313_v11 = vpack.c.bf16 %v122_v9, %v121_v7  ;;  %v124_v13 = vld [vmem:[%s520_s3 + $0x28] sm:$0xff] }
   0x4   :  { %308 = vmatpush3.bf16.msra.mxu0 %v307_v3  ;;  %v123_v12 = vld [vmem:[%s520_s3 + $0x20] sm:$0xff] }
   0x5   :  { %311 = vmatpush3.bf16.msra.mxu1 %v310_v8 }
   0x6   :  { %312 = vmatprep.subr.bf16.mxu1 %v390_v2 }
   0x7   :  { %269 = vmatmul.mubr.msk.f32.vlgmr.msra.gmra.mrb[0].mxu0 %vm34_vm1, %v24_v10 }
   0x8   :  { %13 = vsyncpa [#allocation5], 0  ;;  %v316_v14 = vpack.c.bf16 %v124_v13, %v123_v12  ;;  %v125_v15 = vld [vmem:[%s520_s3 + $0x30] sm:$0xff]  ;;  %v126_v16 = vld [vmem:[%s520_s3 + $0x38] sm:$0xff]  ;;  %s393_s11 = smov [#allocation2]  }
   0x9   :  { %314 = vmatpush3.bf16.msra.mxu1 %v313_v11  ;;  %v319_v17 = vpack.c.bf16 %v126_v16, %v125_v15  ;;  %v127_v18 = vld [vmem:[%s520_s3 + $0x40] sm:$0xff]  ;;  %v128_v19 = vld [vmem:[%s520_s3 + $0x48] sm:$0xff]  ;;  %v129_v21 = vld [vmem:[%s520_s3 + $0x50] sm:$0xff]  ;;  %s219_s12 = sshll.u32 %s393_s11, 4  ;;  %s220_s12 = int_to_ptr.vmem [resolvable:$true] %s219_s12 }
   0xa   :  { %315 = vmatprep.subr.bf16.mxu1 %v390_v2  ;;  %v322_v20 = vpack.c.bf16 %v128_v19, %v127_v18  ;;  %v130_v22 = vld [vmem:[%s520_s3 + $0x58] sm:$0xff]  ;;  %v131_v24 = vld [vmem:[%s520_s3 + $0x60] sm:$0xff]  ;;  %v132_v25 = vld [vmem:[%s520_s3 + $0x68] sm:$0xff]  ;;  %p347_p1 = scmp.lt.s32.totalorder %s220_s12, %s220_s12 }
   0xb   :  { %v325_v23 = vpack.c.bf16 %v130_v22, %v129_v21  ;;  %v328_v26 = vpack.c.bf16 %v132_v25, %v131_v24  ;;  %v133_v27 = vld [vmem:[%s520_s3 + $0x70] sm:$0xff]  ;;  %v134_v28 = vld [vmem:[%s520_s3 + $0x78] sm:$0xff]  ;;  %v241_v30 = vld [vmem:[%s519_s2] ss:$0 sm:$0xff]  ;;  %s342_s2 = scalar_lea.vmem %s220_s12, 128 }
   0xc   :  { %v331_v29 = vpack.c.bf16 %v134_v28, %v133_v27  ;;  %v243_v39 = vld [vmem:[%s521_s4] ss:$0 sm:$0xff]  ;;  %p343_p0 = scmp.ne.s32.totalorder %s220_s12, %s342_s2  ;;  %p348_p2 = scmp.lt.s32.totalorder %s342_s2, %s342_s2 }
   0xd   :  { %317 = vmatpush3.bf16.msra.mxu1 %v316_v14 }
   0xe   :  { %318 = vmatprep.subr.bf16.mxu1 %v390_v2  ;;  %p349_p3 = por %p348_p2, %p347_p1 }
  0x10   :  { %p350_p4 = pnand %p349_p3, %p343_p0 }
  0x11   :  { %320 = vmatpush3.bf16.msra.mxu1 %v319_v17 }
  0x12   :  { %321 = vmatprep.subr.bf16.mxu1 %v390_v2 }
  0x15   :  { %323 = vmatpush3.bf16.msra.mxu1 %v322_v20 }
  0x16   :  { %324 = vmatprep.subr.bf16.mxu1 %v390_v2 }
  0x19   :  { %326 = vmatpush3.bf16.msra.mxu1 %v325_v23 }
  0x1a   :  { %327 = vmatprep.subr.bf16.mxu1 %v390_v2 }
  0x1d   :  { %329 = vmatpush3.bf16.msra.mxu1 %v328_v26 }
  0x1e   :  { %330 = vmatprep.subr.bf16.mxu1 %v390_v2 }
  0x21   :  { %332 = vmatpush3.bf16.msra.mxu1 %v331_v29 }
  0xda   :  { %v104_v31 = vpop.f32.mrb[0].mxu0 }
  0xdb   :  { %v105_v32 = vadd.f32 %v241_v30, %v104_v31  ;;  %v270_v33 = vpop.f32.mrb[1].mxu0 }
  0xdd   :  { %108 = vmax.xlane.f32.xlu0 %v105_v32  ;;  %v118_v34 = vmax.f32 %v105_v32, 0.0 }
  0xdf   :  { %304 = vmatmul.mubr.f32.vlgmr.msra.gmra.mrb[0].mxu1 %v118_v34 }
 0x16a   :  { %v109_v35 = vpop.xlane.xlu0 %108 }
 0x16b   :  { %v110_v36 = vsub.f32 %v105_v32, %v109_v35 }
 0x16d   :  { %v111_v37 = vmul.f32 1.442695, %v110_v36 }
 0x16f   :  { %338 = vpow2.f32 %v111_v37 }
 0x179   :  { %v339_v38 = vpop.eup %338 }
 0x17a   :  { %113 = vadd.xlane.f32.xlu0 %v339_v38 }
 0x1b2   :  { %v208_v40 = vpop.f32.mrb[0].mxu1 }
 0x1b3   :  { %v209_v41 = vadd.f32 %v243_v39, %v208_v40  ;;  %v305_v42 = vpop.f32.mrb[1].mxu1 }
 0x1b5   :  { %212 = vst [vmem:[#allocation2] sm:$0xff] %v209_v41 }
 0x1b6   :  { %353 = shalt.err (!%p350_p4)
}
 0x1b7   :  { %s354_s15 = scalar_lea.hbm %s522_s5, 128 }
 0x1b8   :  { %p355_p5 = scmp.ne.s32.totalorder %s522_s5, %s354_s15  ;;  %p358_p6 = scmp.lt.u32.totalorder %s354_s15, %s522_s5 }
 0x1ba   :  { %p360_p7 = pnand %p358_p6, %p355_p5 }
 0x1bc   :  { %363 = shalt.err (!%p360_p7)
}
 0x1bd   :  { %222 = dma.vmem_to_hbm [thread:$0]  %s220_s12, 128, %s522_s5, [#allocation3]  }
 0x1be   :  { %s394_s20 = smov [#allocation4]  }
 0x1bf   :  { %s229_s21 = sshll.u32 %s394_s20, 4  ;;  %s230_s21 = int_to_ptr.vmem [resolvable:$true] %s229_s21 }
 0x1c0   :  { %s364_s22 = scalar_lea.vmem %s230_s21, 128  ;;  %p369_p9 = scmp.lt.s32.totalorder %s230_s21, %s230_s21 }
 0x1c1   :  { %p365_p8 = scmp.ne.s32.totalorder %s230_s21, %s364_s22  ;;  %p370_p10 = scmp.lt.s32.totalorder %s364_s22, %s364_s22 }
 0x1c3   :  { %p371_p11 = por %p370_p10, %p369_p9 }
 0x1c5   :  { %p372_p12 = pnand %p371_p11, %p365_p8 }
 0x207   :  { %v114_v43 = vpop.xlane.xlu0 %113 }
 0x208   :  { %340 = vrcp.f32 %v114_v43 }
 0x212   :  { %v341_v44 = vpop.eup %340 }
 0x213   :  { %v116_v45 = vmul.f32 %v341_v44, %v339_v38 }
 0x215   :  { %117 = vst [vmem:[#allocation4] sm:$0xff] %v116_v45 }
 0x216   :  { %375 = shalt.err (!%p372_p12)
}
 0x217   :  { %s376_s25 = scalar_lea.hbm %s523_s6, 128 }
 0x218   :  { %p377_p13 = scmp.ne.s32.totalorder %s523_s6, %s376_s25  ;;  %p380_p0 = scmp.lt.u32.totalorder %s376_s25, %s523_s6 }
 0x21a   :  { %p382_p1 = pnand %p380_p0, %p377_p13 }
 0x21c   :  { %385 = shalt.err (!%p382_p1)
}
 0x21d   :  { %232 = dma.vmem_to_hbm [thread:$0]  %s230_s21, 128, %s523_s6, [#allocation5]  }
 0x21e   :  { %386 = dma.done.wait [#allocation3], 128  }
 0x21f   :  { %387 = vsyncadd [#allocation3], 4294967168 }
 0x220   :  { %388 = dma.done.wait [#allocation5], 128  }
 0x221   :  { %389 = vsyncadd [#allocation5], 4294967168 }
 0x222   :  { %239 = vsyncpa [#allocation3], 1 }
 0x223   :  { %240 = vsyncpa [#allocation5], 1 }

</bundles_post_ra>
